<compile_context>
chip_gen: v7x
topology: tpu7x:2x2x1
jax: 0.10.0
libtpu: 0.0.40
codegen_flags: <defaults>
</compile_context>

<pallas_src>
import functools

import jax
import jax.numpy as jnp
from jax.experimental import pallas as pl
from jax.experimental.pallas import tpu as pltpu


def _round_up(x, m):
    return (x + m - 1) // m * m


def sora_kernel(x_ref, wx_ref, w2_ref, b_ref, o_ref, *, cout_pad):
    # Single fused x-side matmul: [TM, Cin] @ [Cin, cout_pad + R], f32 accum.
    h_all = jnp.dot(x_ref[...], wx_ref[...], preferred_element_type=jnp.float32)
    base = h_all[:, :cout_pad]      # base linear output  [TM, cout_pad]
    h = h_all[:, cout_pad:]         # gated low-rank acts [TM, R] (g pre-folded)
    # Low-rank up-projection: [TM, R] @ [R, cout_pad], f32 accum.
    lora = jnp.dot(h.astype(jnp.bfloat16), w2_ref[...],
                   preferred_element_type=jnp.float32)
    o_ref[...] = (base + b_ref[...] + lora).astype(o_ref.dtype)


@functools.partial(jax.jit, static_argnames=("tile_m",))
def sora_forward(x2d, w_fc, b_fc, w1, g, w2, tile_m=256):
    """x2d: [M, Cin]; w_fc: [Cout, Cin]; b_fc: [Cout]; w1: [R, Cin]; g: [R]; w2: [Cout, R]."""
    M, Cin = x2d.shape
    Cout = w_fc.shape[0]
    R = w1.shape[0]
    cout_pad = _round_up(Cout, 128)

    # ---- Weight prep (glue). For static/frozen adapter weights this should be
    # done once at load time; here it lives inside the jit'd wrapper so it is a
    # tiny fused prologue per call (shapes are [Cin, *] / [R, *] constants).
    wfc_t = jnp.zeros((Cin, cout_pad), w_fc.dtype).at[:, :Cout].set(w_fc.T)
    w1g_t = (w1 * g[:, None]).T                                   # [Cin, R], gate folded in
    wx = jnp.concatenate([wfc_t, w1g_t], axis=1).astype(jnp.bfloat16)   # [Cin, cout_pad+R]
    w2p = (jnp.zeros((R, cout_pad), w2.dtype).at[:, :Cout].set(w2.T)
           .astype(jnp.bfloat16))                                  # [R, cout_pad]
    b_row = jnp.zeros((1, cout_pad), jnp.float32).at[:, :Cout].set(b_fc)

    # ---- Activation prep: bf16 operands, pad M to a tile multiple. ----
    tm = min(tile_m, _round_up(M, 8))
    m_pad = _round_up(M, tm)
    xb = x2d.astype(jnp.bfloat16)
    if m_pad != M:
        xb = jnp.zeros((m_pad, Cin), jnp.bfloat16).at[:M].set(xb)

    out = pl.pallas_call(
        functools.partial(sora_kernel, cout_pad=cout_pad),
        out_shape=jax.ShapeDtypeStruct((m_pad, cout_pad), x2d.dtype),
        grid=(m_pad // tm,),
        in_specs=[
            # activations: tiled over M, double-buffered by the pipeline
            pl.BlockSpec((tm, Cin), lambda i: (i, 0)),
            # weights / bias: same block index every step => VMEM-resident
            pl.BlockSpec((Cin, cout_pad + R), lambda i: (0, 0)),
            pl.BlockSpec((R, cout_pad), lambda i: (0, 0)),
            pl.BlockSpec((1, cout_pad), lambda i: (0, 0)),
        ],
        out_specs=pl.BlockSpec((tm, cout_pad), lambda i: (i, 0)),
        compiler_params=pltpu.CompilerParams(
            dimension_semantics=("parallel",),
        ),
    )(xb, wx, w2p, b_row)

    # Drop the lane padding (and any row padding) added for the kernel.
    return out[:M, :Cout]


if __name__ == "__main__":
    # Small shapes consistent with the module: x is [batch, seq, in_channels].
    batch, seq = 2, 8
    in_channels, out_channels, max_rank = 32, 64, 8

    key = jax.random.PRNGKey(0)
    kx, kwfc, kb, kw1, kg, kw2 = jax.random.split(key, 6)

    x = jax.random.normal(kx, (batch, seq, in_channels), dtype=jnp.float32)

    # Deterministic synthetic parameters (nn.Linear-style shapes). PyTorch
    # `activate()` zero-inits W2 and sets g=ones; we use nonzero values so the
    # low-rank path is actually exercised.
    w_fc = jax.random.normal(kwfc, (out_channels, in_channels), dtype=jnp.float32) * 0.1
    b_fc = jax.random.normal(kb, (out_channels,), dtype=jnp.float32) * 0.1
    w1 = jax.random.normal(kw1, (max_rank, in_channels), dtype=jnp.float32) * 0.1
    w2 = jax.random.normal(kw2, (out_channels, max_rank), dtype=jnp.float32) * 0.1
    g = jax.random.normal(kg, (max_rank,), dtype=jnp.float32)

    # Flatten leading dims like nn.Linear does, run kernel, reshape back.
    x2d = x.reshape(batch * seq, in_channels)
    out = sora_forward(x2d, w_fc, b_fc, w1, g, w2)
    out = jax.block_until_ready(out).reshape(batch, seq, out_channels)

    # Reference check against plain f32 JAX (same semantics as PyTorch forward).
    # Tolerance loosened because kernel operands are bf16 (f32 accumulation).
    ref = x @ w_fc.T + b_fc + ((x @ w1.T) * g) @ w2.T
    assert jnp.allclose(out, ref, atol=5e-2, rtol=5e-2), "mismatch vs reference"

    print("KERNEL_OK")
</pallas_src>

<mosaic_0001>
module attributes {stable_mosaic.version = 11 : i64} {
  func.func @sora_kernel(%arg0: i32, %arg1: memref<16x32xbf16, #tpu.memory_space<vmem>>, %arg2: memref<32x136xbf16, #tpu.memory_space<vmem>>, %arg3: memref<8x128xbf16, #tpu.memory_space<vmem>>, %arg4: memref<1x128xf32, #tpu.memory_space<vmem>>, %arg5: memref<16x128xf32, #tpu.memory_space<vmem>>) attributes {dimension_semantics = [#tpu.dimension_semantics<parallel>], iteration_bounds = array<i64: 1>, scalar_prefetch = 0 : i64, scratch_operands = 0 : i64, tpu.core_type = #tpu.core_type<tc>, window_params = [{transform_indices = @transform_0, window_bounds = array<i64: 16, 32>}, {pipeline_mode = #tpu.pipeline_mode<synchronous>, transform_indices = @transform_1, window_bounds = array<i64: 32, 136>}, {pipeline_mode = #tpu.pipeline_mode<synchronous>, transform_indices = @transform_2, window_bounds = array<i64: 8, 128>}, {pipeline_mode = #tpu.pipeline_mode<synchronous>, transform_indices = @transform_3, window_bounds = array<i64: 1, 128>}, {transform_indices = @transform_4, window_bounds = array<i64: 16, 128>}]} {
    %c0 = arith.constant 0 : index
    %c0_0 = arith.constant 0 : index
    %0 = vector.load %arg1[%c0, %c0_0] : memref<16x32xbf16, #tpu.memory_space<vmem>>, vector<16x32xbf16>
    %c0_1 = arith.constant 0 : index
    %c0_2 = arith.constant 0 : index
    %1 = vector.load %arg2[%c0_1, %c0_2] : memref<32x136xbf16, #tpu.memory_space<vmem>>, vector<32x136xbf16>
    %cst = arith.constant dense<0.000000e+00> : vector<16x136xf32>
    %2 = tpu.matmul %0, %1, %cst {dimension_numbers = #tpu.dot_dimension_numbers<[1], [0], [0], [1], [0, 0, 1, 1], [], []>} : vector<16x32xbf16>, vector<32x136xbf16>, vector<16x136xf32> -> vector<16x136xf32>
    %3 = vector.extract_strided_slice %2 {offsets = [0, 0], sizes = [16, 128], strides = [1, 1]} : vector<16x136xf32> to vector<16x128xf32>
    %4 = vector.extract_strided_slice %2 {offsets = [0, 128], sizes = [16, 8], strides = [1, 1]} : vector<16x136xf32> to vector<16x8xf32>
    %5 = arith.truncf %4 : vector<16x8xf32> to vector<16x8xbf16>
    %c0_3 = arith.constant 0 : index
    %c0_4 = arith.constant 0 : index
    %6 = vector.load %arg3[%c0_3, %c0_4] : memref<8x128xbf16, #tpu.memory_space<vmem>>, vector<8x128xbf16>
    %cst_5 = arith.constant dense<0.000000e+00> : vector<16x128xf32>
    %7 = tpu.matmul %5, %6, %cst_5 {dimension_numbers = #tpu.dot_dimension_numbers<[1], [0], [0], [1], [0, 0, 1, 1], [], []>} : vector<16x8xbf16>, vector<8x128xbf16>, vector<16x128xf32> -> vector<16x128xf32>
    %c0_6 = arith.constant 0 : index
    %c0_7 = arith.constant 0 : index
    %8 = vector.load %arg4[%c0_6, %c0_7] : memref<1x128xf32, #tpu.memory_space<vmem>>, vector<1x128xf32>
    %9 = vector.broadcast %8 : vector<1x128xf32> to vector<16x128xf32>
    %10 = arith.addf %3, %9 : vector<16x128xf32>
    %11 = arith.addf %10, %7 : vector<16x128xf32>
    %c0_8 = arith.constant 0 : index
    %c0_9 = arith.constant 0 : index
    %12 = vector.load %arg5[%c0_8, %c0_9] : memref<16x128xf32, #tpu.memory_space<vmem>>, vector<16x128xf32>
    tpu.vector_store %arg5[%c0_8, %c0_9], %11 {strides = array<i32>} : memref<16x128xf32, #tpu.memory_space<vmem>>, vector<16x128xf32>,
    return
  }
  func.func @transform_0(%arg0: i32) -> (i32, i32) {
    %c0_i32 = arith.constant 0 : i32
    %c0_i32_0 = arith.constant 0 : i32
    return %arg0, %c0_i32 : i32, i32
  }
  func.func @transform_1(%arg0: i32) -> (i32, i32) {
    %c0_i32 = arith.constant 0 : i32
    %c0_i32_0 = arith.constant 0 : i32
    %c0_i32_1 = arith.constant 0 : i32
    return %c0_i32, %c0_i32_0 : i32, i32
  }
  func.func @transform_2(%arg0: i32) -> (i32, i32) {
    %c0_i32 = arith.constant 0 : i32
    %c0_i32_0 = arith.constant 0 : i32
    %c0_i32_1 = arith.constant 0 : i32
    return %c0_i32, %c0_i32_0 : i32, i32
  }
  func.func @transform_3(%arg0: i32) -> (i32, i32) {
    %c0_i32 = arith.constant 0 : i32
    %c0_i32_0 = arith.constant 0 : i32
    %c0_i32_1 = arith.constant 0 : i32
    return %c0_i32, %c0_i32_0 : i32, i32
  }
  func.func @transform_4(%arg0: i32) -> (i32, i32) {
    %c0_i32 = arith.constant 0 : i32
    %c0_i32_0 = arith.constant 0 : i32
    return %arg0, %c0_i32 : i32, i32
  }
}

</mosaic_0001>

<bundles_post_ra>
// kernel: sora_forward.1
= control target key start
LH: loop header
LB: loop body
LE: loop exit
PB: predicated region body
PF: predicated region fallthrough
CT: control target
= control target key end

     0   :  { %v230_v2 = vmov 0   ;;  %s294_s0 = inlined_call_operand.vmem [shape: bf16[16,32], index: 0, kind: input, shape index: {}]   ;;  %s295_s1 = inlined_call_operand.vmem [shape: bf16[32,136], index: 1, kind: input, shape index: {}]   ;;  %s296_s2 = inlined_call_operand.vmem [shape: bf16[8,128], index: 2, kind: input, shape index: {}]   ;;  %s297_s3 = inlined_call_operand.vmem [shape: f32[1,128], index: 3, kind: input, shape index: {}]   ;;  %s298_s4 = inlined_call_operand.hbm [shape: f32[16,128], index: 4, kind: output, shape index: {}]  }
   0x1   :  { %v199_v0 = vld [vmem:[%s295_s1 + $0x4] ss:$8 sps:$4 sm:$0xff]   ;;  %v201_v1 = vld [vmem:[%s295_s1] ss:$8 sps:$4 sm:$0xff]   ;;  %86 = vmatprep.mubr.bf16.mxu0 %v230_v2  ;;  %v202_v3 = vld [vmem:[%s295_s1 + $0x14] ss:$8 sps:$4 sm:$0xff]  }
   0x2   :  { %54 = vmatprep.subr.bf16.mxu0 %v199_v0  ;;  %v204_v4 = vld [vmem:[%s295_s1 + $0x10] ss:$8 sps:$4 sm:$0xff]  }
   0x3   :  { %55 = vmatpush1.bf16.msra.mxu0 %v201_v1 }
   0x4   :  { %9 = vsyncpa [#allocation3], 0  ;;  %56 = vmatprep.subr.bf16.mxu0 %v202_v3  ;;  %v205_v5 = vld [vmem:[%s294_s0] sm:$0xff]   ;;  %vm50_vm0 = vcmask 261120   ;;  %vm103_vm1 = vcmask 1043456   ;;  %v231_v7 = vmov 0.0  }
   0x5   :  { %v98_v6 = vld [vmem:[%s296_s2] sm:$0xf]  ;;  %187 = vmatprep.subr.bf16.mxu1 %v231_v7  ;;  %vm232_vm2 = vmmov 0   ;;  %vm99_vm3 = vcmask 64512   ;;  %s233_s2 = smov [#allocation2]  }
   0x6   :  { %v105_v8 = vsel %vm103_vm1, %v98_v6, 0  ;;  %189 = vmatprep.mubr.msk.bf16.mxu1 %vm232_vm2, %v231_v7  ;;  %v184_v14 = vld [vmem:[%s297_s3] ss:$0 sm:$0xff]  ;;  %s166_s27 = sshll.u32 %s233_s2, 4  ;;  %s167_s27 = int_to_ptr.vmem [resolvable:$true] %s166_s27 }
   0x7   :  { %57 = vmatpush1.bf16.msra.mxu0 %v204_v4  ;;  %188 = vmatpush3.bf16.msra.mxu1 %v105_v8  ;;  %s206_s28 = scalar_lea.vmem %s167_s27, 256  ;;  %p211_p1 = scmp.lt.s32.totalorder %s167_s27, %s167_s27 }
   0x8   :  { %p207_p0 = scmp.ne.s32.totalorder %s167_s27, %s206_s28  ;;  %p212_p2 = scmp.lt.s32.totalorder %s206_s28, %s206_s28 }
   0xa   :  { %182 = vmatmul.mubr.msk.bf16.vlgmr.msra.gmra.mrb[0].mxu0 %vm50_vm0, %v205_v5  ;;  %p213_p3 = por %p212_p2, %p211_p1 }
   0xc   :  { %p214_p4 = pnand %p213_p3, %p207_p0 }
  0xdd   :  { %v88_v9 = vpop.f32.mrb[0].mxu0 }
  0xde   :  { %v90_v10 = vpop.f32.mrb[1].mxu0  ;;  %v155_v15 = vadd.f32 %v184_v14, %v88_v9 }
  0xdf   :  { %v92_v11 = vpop.f32.mrb[2].mxu0 }
  0xe0   :  { %v94_v12 = vpop.f32.mrb[3].mxu0  ;;  %v156_v17 = vadd.f32 %v184_v14, %v92_v11 }
  0xe1   :  { %v97_v13 = vpack.c.bf16 %v94_v12, %v90_v10 }
  0xe3   :  { %190 = vmatmul.mubr.msk.bf16.vlgmr.msra.gmra.mrb[0].mxu1 %vm99_vm3, %v97_v13 }
 0x1b6   :  { %v141_v16 = vpop.f32.mrb[0].mxu1 }
 0x1b7   :  { %v157_v18 = vadd.f32 %v155_v15, %v141_v16  ;;  %v191_v19 = vpop.f32.mrb[1].mxu1 }
 0x1b8   :  { %v144_v20 = vpop.f32.mrb[2].mxu1 }
 0x1b9   :  { %159 = vst [vmem:[#allocation2] sm:$0xff] %v157_v18  ;;  %v158_v21 = vadd.f32 %v156_v17, %v144_v20  ;;  %v192_v22 = vpop.f32.mrb[3].mxu1 }
 0x1bb   :  { %160 = vst [vmem:[#allocation2 + $0x8] sm:$0xff] %v158_v21 }
 0x1bc   :  { %217 = shalt.err (!%p214_p4)
}
 0x1bd   :  { %s218_s30 = scalar_lea.hbm %s298_s4, 256 }
 0x1be   :  { %p219_p5 = scmp.ne.s32.totalorder %s298_s4, %s218_s30  ;;  %p222_p6 = scmp.lt.u32.totalorder %s218_s30, %s298_s4 }
 0x1c0   :  { %p224_p7 = pnand %p222_p6, %p219_p5 }
 0x1c2   :  { %227 = shalt.err (!%p224_p7)
}
 0x1c3   :  { %s234_s9 = smov 128   ;;  %s235_s10 = smov 8  }
 0x1c4   :  { %172 = dma.vmem_to_hbm [thread:$0]  %s167_s27, 256, %s298_s4, [#allocation3], %s234_s9, %s234_s9, %s235_s10  }
 0x1c5   :  { %228 = dma.done.wait [#allocation3], 256  }
 0x1c6   :  { %229 = vsyncadd [#allocation3], 4294967040 }
 0x1c7   :  { %176 = vsyncpa [#allocation3], 1 }

</bundles_post_ra>
